<compile_context>
chip_gen: v6e
topology: v6e:2x2x1
jax: 0.10.0
libtpu: 0.0.40
codegen_flags: <defaults>
</compile_context>

<pallas_src>
import functools

import jax
import jax.numpy as jnp
from jax.experimental import pallas as pl
from jax.experimental.pallas import tpu as pltpu


def _conv_upsample_kernel(x_ref, ah_ref, awt_ref, wmix_ref, shiftr_ref,
                          o_ref, slab_ref, *, C, Hi, Ho, tc, compute_dtype):
    """One (batch, channel-tile) per grid step.

    x_ref:      (1, C*Hi, Wi)   VMEM  all input channels, channel-collapsed
    ah_ref:     (Ho, Hi)        VMEM  height interpolation matrix
    awt_ref:    (Wi, Wo)        VMEM  width interpolation matrix (transposed)
    wmix_ref:   (C, C)          SMEM  BN-scale-folded 1x1 conv weight
    shiftr_ref: (tc*Ho, 1)      VMEM  folded BN shift, repeated per output row
    o_ref:      (1, tc*Ho, Wo)  VMEM  output block (channel-collapsed)
    slab_ref:   (tc*Ho, Wi)     VMEM  scratch: height-interped channel tile
    """
    t = pl.program_id(1)                     # channel-tile index
    ah = ah_ref[...]                         # (Ho, Hi), grid-invariant

    # Hoist the C input-channel tiles out of the o-loop: C loads total
    # instead of tc*C (for large C the regalloc spills back to VMEM, which is
    # equivalent traffic; for the common small-C stages they stay resident).
    xs = [x_ref[0, c * Hi:(c + 1) * Hi, :] for c in range(C)]

    for o in range(tc):                      # bounded unroll: tc <= 8
        oc = t * tc + o                      # global output channel
        # ---- BN-folded 1x1 conv, applied before the upsample (they commute).
        # VPU FMAs with SMEM scalar broadcasts; overlaps under the MXU work.
        acc = wmix_ref[oc, 0] * xs[0]
        for c in range(1, C):
            acc = acc + wmix_ref[oc, c] * xs[c]

        # ---- height interpolation for this channel: MXU matmul (M=Ho, N=Wi).
        th = jnp.dot(ah, acc.astype(compute_dtype),
                     preferred_element_type=jnp.float32)          # (Ho, Wi)
        slab_ref[o * Ho:(o + 1) * Ho, :] = th.astype(slab_ref.dtype)

    # ---- width interpolation for the WHOLE channel tile as one big MXU
    # matmul (M=tc*Ho, K=Wi, N=Wo); its result is the output block, stored
    # once per grid step (single dense write, + folded BN shift).
    out = jnp.dot(slab_ref[...], awt_ref[...],
                  preferred_element_type=jnp.float32)             # (tc*Ho, Wo)
    o_ref[0] = (out + shiftr_ref[...]).astype(o_ref.dtype)


def _interp_matrix(out_size: int, in_size: int) -> jnp.ndarray:
    """Dense (out_size, in_size) bilinear interpolation matrix, align_corners=True."""
    if out_size == 1:
        src = jnp.zeros((1,), jnp.float32)
    else:
        src = jnp.arange(out_size, dtype=jnp.float32) * ((in_size - 1) / (out_size - 1))
    i0 = jnp.clip(jnp.floor(src).astype(jnp.int32), 0, in_size - 1)
    i1 = jnp.clip(i0 + 1, 0, in_size - 1)
    frac = src - i0.astype(jnp.float32)
    return (jax.nn.one_hot(i0, in_size, dtype=jnp.float32) * (1.0 - frac)[:, None]
            + jax.nn.one_hot(i1, in_size, dtype=jnp.float32) * frac[:, None])


def _pick_channel_tile(C, Ho, Wo, out_itemsize, tc_max=8, out_block_budget=4 << 20):
    """Largest divisor of C that keeps blocks legal ((tc*Ho)%8==0 unless tc==C),
    bounded-unrolled (<= tc_max) and within the output-block VMEM budget."""
    divisors = [t for t in range(1, C + 1) if C % t == 0]
    valid = [t for t in divisors if t == C or (t * Ho) % 8 == 0]
    good = [t for t in valid
            if t <= tc_max and t * Ho * Wo * out_itemsize <= out_block_budget]
    if good:
        return max(good)
    return min(valid)        # smallest legal tile (valid always contains C)


def conv_upsample(x, target_hw, conv_w, bn_gamma, bn_beta, bn_mean, bn_var,
                  eps=1e-5, compute_dtype=None):
    """Forward pass of Conv_upsample.

    compute_dtype: dtype of the MXU interpolation operands (accumulation is
    always f32).  Default f32 matches the PyTorch module and is the right
    choice on v5e; jnp.bfloat16 is an opt-in for v6e/v7x (halves interp-matrix
    DMA and roughly doubles MXU rate there).
    """
    N, C, Hi, Wi = x.shape
    Ho, Wo = int(target_hw[0]), int(target_hw[1])
    if (Hi, Wi) == (Ho, Wo):
        return x  # PyTorch forward: identity when spatial sizes already match

    cd = jnp.dtype(compute_dtype) if compute_dtype is not None else jnp.dtype(jnp.float32)
    itemsize = x.dtype.itemsize

    ah = _interp_matrix(Ho, Hi).astype(cd)               # (Ho, Hi)
    awt = _interp_matrix(Wo, Wi).T.astype(cd)            # (Wi, Wo)

    # Fold eval-mode BatchNorm into the 1x1 conv weight + a per-channel shift.
    w2d = conv_w.reshape(C, C).astype(jnp.float32)
    scale = bn_gamma.astype(jnp.float32) / jnp.sqrt(bn_var.astype(jnp.float32) + eps)
    shift = bn_beta.astype(jnp.float32) - bn_mean.astype(jnp.float32) * scale
    wmix = w2d * scale[:, None]                          # (C, C)

    # Channel tiling: bounded unroll, v7x-friendly block sizes, 2nd parallel axis.
    tc = _pick_channel_tile(C, Ho, Wo, itemsize)
    n_ct = C // tc

    # Per-output-row shift (channel-major, repeated Ho times) -> one vector add.
    shift_rows = jnp.repeat(shift, Ho)[:, None]          # (C*Ho, 1) f32

    # Channel-collapsed views: free reshapes in HBM, no in-kernel relayout.
    xf = x.reshape(N, C * Hi, Wi)

    # Explicit scoped-VMEM limit from the actual double-buffered blocks.
    blk_bytes = (C * Hi * Wi * itemsize                  # x block
                 + tc * Ho * Wo * itemsize               # out block
                 + (Ho * Hi + Wi * Wo) * cd.itemsize     # ah, awt
                 + tc * Ho * 4)                          # shift rows block
    vmem_est = 2 * blk_bytes + tc * Ho * Wi * cd.itemsize + (4 << 20)
    vmem_limit = int(min(max(vmem_est, 20 << 20), 56 << 20))

    flops = 2 * N * (C * C * Hi * Wi            # channel mix (VPU)
                     + C * Ho * Hi * Wi         # height interpolation (MXU)
                     + C * Ho * Wi * Wo)        # width interpolation (MXU)
    bytes_accessed = int(N * C * Hi * Wi * itemsize
                         + N * C * Ho * Wo * itemsize
                         + (ah.size + awt.size) * cd.itemsize
                         + (wmix.size + shift_rows.size) * 4)

    kernel = functools.partial(_conv_upsample_kernel,
                               C=C, Hi=Hi, Ho=Ho, tc=tc, compute_dtype=cd)

    out_flat = pl.pallas_call(
        kernel,
        out_shape=jax.ShapeDtypeStruct((N, C * Ho, Wo), x.dtype),
        grid=(N, n_ct),
        in_specs=[
            pl.BlockSpec((1, C * Hi, Wi), lambda n, t: (n, 0, 0)),   # x (all in-channels)
            pl.BlockSpec((Ho, Hi), lambda n, t: (0, 0)),             # A_h
            pl.BlockSpec((Wi, Wo), lambda n, t: (0, 0)),             # A_w^T
            pl.BlockSpec(memory_space=pltpu.MemorySpace.SMEM),       # wmix (C, C)
            pl.BlockSpec((tc * Ho, 1), lambda n, t: (t, 0)),         # shift rows
        ],
        out_specs=pl.BlockSpec((1, tc * Ho, Wo), lambda n, t: (n, t, 0)),
        scratch_shapes=[pltpu.VMEM((tc * Ho, Wi), cd)],
        compiler_params=pltpu.CompilerParams(
            dimension_semantics=("parallel", "parallel"),
            vmem_limit_bytes=vmem_limit),
        cost_estimate=pl.CostEstimate(flops=int(flops), transcendentals=0,
                                      bytes_accessed=bytes_accessed),
    )(xf, ah, awt, wmix, shift_rows)

    return out_flat.reshape(N, C, Ho, Wo)


def _reference(x, Ho, Wo, w2d, scale, shift):
    """Plain-JAX reference: gather-based bilinear (align_corners=True) + 1x1 conv + BN."""
    N, C, Hi, Wi = x.shape
    ys = jnp.linspace(0.0, Hi - 1.0, Ho)
    xs = jnp.linspace(0.0, Wi - 1.0, Wo)
    y0 = jnp.clip(jnp.floor(ys).astype(jnp.int32), 0, Hi - 1)
    y1 = jnp.clip(y0 + 1, 0, Hi - 1)
    x0 = jnp.clip(jnp.floor(xs).astype(jnp.int32), 0, Wi - 1)
    x1 = jnp.clip(x0 + 1, 0, Wi - 1)
    fy = (ys - y0.astype(jnp.float32))[None, None, :, None]
    fx = (xs - x0.astype(jnp.float32))[None, None, None, :]
    g = lambda yi, xi: x[:, :, yi, :][:, :, :, xi]
    up = ((1 - fy) * (1 - fx) * g(y0, x0) + (1 - fy) * fx * g(y0, x1)
          + fy * (1 - fx) * g(y1, x0) + fy * fx * g(y1, x1))
    conv = jnp.einsum('oc,nchw->nohw', w2d, up)
    return conv * scale[None, :, None, None] + shift[None, :, None, None]


if __name__ == "__main__":
    key = jax.random.PRNGKey(0)
    kx, kt, kw, kg, kb, km, kv = jax.random.split(key, 7)
    N, C, Hi, Wi = 2, 4, 8, 8
    Ho, Wo = 16, 16

    x = jax.random.normal(kx, (N, C, Hi, Wi), jnp.float32)
    target = jax.random.normal(kt, (N, C, Ho, Wo), jnp.float32)

    # Parameter shapes from BasicConv2d(channel, channel, 1):
    #   Conv2d(C, C, 1, bias=False).weight -> (C, C, 1, 1)
    #   BatchNorm2d(C): weight/bias/running_mean/running_var -> (C,)
    conv_w = 0.5 * jax.random.normal(kw, (C, C, 1, 1), jnp.float32)
    bn_gamma = 1.0 + 0.1 * jax.random.normal(kg, (C,), jnp.float32)
    bn_beta = 0.1 * jax.random.normal(kb, (C,), jnp.float32)
    bn_mean = 0.1 * jax.random.normal(km, (C,), jnp.float32)
    bn_var = jnp.abs(1.0 + 0.1 * jax.random.normal(kv, (C,), jnp.float32))

    # --- f32 path (module-faithful numerics, v5e default) ---
    y = conv_upsample(x, target.shape[2:], conv_w, bn_gamma, bn_beta, bn_mean, bn_var)
    y = jax.block_until_ready(y)
    assert y.shape == (N, C, Ho, Wo), y.shape

    eps = 1e-5
    scale = bn_gamma / jnp.sqrt(bn_var + eps)
    shift = bn_beta - bn_mean * scale
    y_ref = _reference(x, Ho, Wo, conv_w.reshape(C, C), scale, shift)
    err = float(jnp.max(jnp.abs(y - y_ref)))
    assert jnp.allclose(y, y_ref, atol=1e-4, rtol=1e-4), err

    # --- bf16 matmul-operand path (opt-in for v6e/v7x); looser tolerance ---
    y_bf16 = conv_upsample(x, target.shape[2:], conv_w, bn_gamma, bn_beta,
                           bn_mean, bn_var, compute_dtype=jnp.bfloat16)
    y_bf16 = jax.block_until_ready(y_bf16)
    err_bf16 = float(jnp.max(jnp.abs(y_bf16 - y_ref)))
    assert jnp.allclose(y_bf16, y_ref, atol=2e-1, rtol=2e-1), err_bf16

    # --- same-spatial-size branch: module returns x unchanged ---
    y_same = conv_upsample(target, target.shape[2:], conv_w, bn_gamma, bn_beta,
                           bn_mean, bn_var)
    assert y_same is target

    print("KERNEL_OK")
</pallas_src>

<mosaic_0001>
module attributes {stable_mosaic.version = 11 : i64} {
  func.func @_conv_upsample_kernel(%arg0: i32, %arg1: i32, %arg2: memref<1x32x8xf32, #tpu.memory_space<vmem>>, %arg3: memref<16x8xf32, #tpu.memory_space<vmem>>, %arg4: memref<8x16xf32, #tpu.memory_space<vmem>>, %arg5: memref<4x4xf32, #tpu.memory_space<smem>>, %arg6: memref<64x1xf32, #tpu.memory_space<vmem>>, %arg7: memref<1x64x16xf32, #tpu.memory_space<vmem>>, %arg8: memref<64x8xf32, #tpu.memory_space<vmem>>) attributes {dimension_semantics = [#tpu.dimension_semantics<parallel>, #tpu.dimension_semantics<parallel>], iteration_bounds = array<i64: 2, 1>, scalar_prefetch = 0 : i64, scratch_operands = 1 : i64, tpu.core_type = #tpu.core_type<tc>, window_params = [{transform_indices = @transform_0, window_bounds = array<i64: 1, 32, 8>}, {pipeline_mode = #tpu.pipeline_mode<synchronous>, transform_indices = @transform_1, window_bounds = array<i64: 16, 8>}, {pipeline_mode = #tpu.pipeline_mode<synchronous>, transform_indices = @transform_2, window_bounds = array<i64: 8, 16>}, {transform_indices = @transform_3, window_bounds = array<i64: 4, 4>}, {transform_indices = @transform_4, window_bounds = array<i64: 64, 1>}, {transform_indices = @transform_5, window_bounds = array<i64: 1, 64, 16>}]} {
    %c0 = arith.constant 0 : index
    %c0_0 = arith.constant 0 : index
    %0 = vector.load %arg3[%c0, %c0_0] : memref<16x8xf32, #tpu.memory_space<vmem>>, vector<16x8xf32>
    %c0_1 = arith.constant 0 : index
    %c0_2 = arith.constant 0 : index
    %c0_3 = arith.constant 0 : index
    %1 = vector.load %arg2[%c0_1, %c0_2, %c0_3] : memref<1x32x8xf32, #tpu.memory_space<vmem>>, vector<1x8x8xf32>
    %2 = vector.shape_cast %1 : vector<1x8x8xf32> to vector<8x8xf32>
    %c0_4 = arith.constant 0 : index
    %c8 = arith.constant 8 : index
    %c0_5 = arith.constant 0 : index
    %3 = vector.load %arg2[%c0_4, %c8, %c0_5] : memref<1x32x8xf32, #tpu.memory_space<vmem>>, vector<1x8x8xf32>
    %4 = vector.shape_cast %3 : vector<1x8x8xf32> to vector<8x8xf32>
    %c0_6 = arith.constant 0 : index
    %c16 = arith.constant 16 : index
    %c0_7 = arith.constant 0 : index
    %5 = vector.load %arg2[%c0_6, %c16, %c0_7] : memref<1x32x8xf32, #tpu.memory_space<vmem>>, vector<1x8x8xf32>
    %6 = vector.shape_cast %5 : vector<1x8x8xf32> to vector<8x8xf32>
    %c0_8 = arith.constant 0 : index
    %c24 = arith.constant 24 : index
    %c0_9 = arith.constant 0 : index
    %7 = vector.load %arg2[%c0_8, %c24, %c0_9] : memref<1x32x8xf32, #tpu.memory_space<vmem>>, vector<1x8x8xf32>
    %8 = vector.shape_cast %7 : vector<1x8x8xf32> to vector<8x8xf32>
    %c4_i32 = arith.constant 4 : i32
    %9 = arith.muli %arg1, %c4_i32 : i32
    %c0_i32 = arith.constant 0 : i32
    %10 = arith.addi %9, %c0_i32 : i32
    %11 = arith.index_cast %10 : i32 to index
    %c0_10 = arith.constant 0 : index
    %12 = memref.load %arg5[%11, %c0_10] : memref<4x4xf32, #tpu.memory_space<smem>>
    %13 = vector.broadcast %12 : f32 to vector<8x8xf32>
    %14 = arith.mulf %13, %2 : vector<8x8xf32>
    %15 = arith.index_cast %10 : i32 to index
    %c1 = arith.constant 1 : index
    %16 = memref.load %arg5[%15, %c1] : memref<4x4xf32, #tpu.memory_space<smem>>
    %17 = vector.broadcast %16 : f32 to vector<8x8xf32>
    %18 = arith.mulf %17, %4 : vector<8x8xf32>
    %19 = arith.addf %14, %18 : vector<8x8xf32>
    %20 = arith.index_cast %10 : i32 to index
    %c2 = arith.constant 2 : index
    %21 = memref.load %arg5[%20, %c2] : memref<4x4xf32, #tpu.memory_space<smem>>
    %22 = vector.broadcast %21 : f32 to vector<8x8xf32>
    %23 = arith.mulf %22, %6 : vector<8x8xf32>
    %24 = arith.addf %19, %23 : vector<8x8xf32>
    %25 = arith.index_cast %10 : i32 to index
    %c3 = arith.constant 3 : index
    %26 = memref.load %arg5[%25, %c3] : memref<4x4xf32, #tpu.memory_space<smem>>
    %27 = vector.broadcast %26 : f32 to vector<8x8xf32>
    %28 = arith.mulf %27, %8 : vector<8x8xf32>
    %29 = arith.addf %24, %28 : vector<8x8xf32>
    %cst = arith.constant dense<0.000000e+00> : vector<16x8xf32>
    %30 = tpu.matmul %0, %29, %cst {dimension_numbers = #tpu.dot_dimension_numbers<[1], [0], [0], [1], [0, 0, 1, 1], [], []>} : vector<16x8xf32>, vector<8x8xf32>, vector<16x8xf32> -> vector<16x8xf32>
    %c0_11 = arith.constant 0 : index
    %c0_12 = arith.constant 0 : index
    %31 = vector.load %arg8[%c0_11, %c0_12] : memref<64x8xf32, #tpu.memory_space<vmem>>, vector<16x8xf32>
    tpu.vector_store %arg8[%c0_11, %c0_12], %30 {strides = array<i32>} : memref<64x8xf32, #tpu.memory_space<vmem>>, vector<16x8xf32>,
    %c4_i32_13 = arith.constant 4 : i32
    %32 = arith.muli %arg1, %c4_i32_13 : i32
    %c1_i32 = arith.constant 1 : i32
    %33 = arith.addi %32, %c1_i32 : i32
    %34 = arith.index_cast %33 : i32 to index
    %c0_14 = arith.constant 0 : index
    %35 = memref.load %arg5[%34, %c0_14] : memref<4x4xf32, #tpu.memory_space<smem>>
    %36 = vector.broadcast %35 : f32 to vector<8x8xf32>
    %37 = arith.mulf %36, %2 : vector<8x8xf32>
    %38 = arith.index_cast %33 : i32 to index
    %c1_15 = arith.constant 1 : index
    %39 = memref.load %arg5[%38, %c1_15] : memref<4x4xf32, #tpu.memory_space<smem>>
    %40 = vector.broadcast %39 : f32 to vector<8x8xf32>
    %41 = arith.mulf %40, %4 : vector<8x8xf32>
    %42 = arith.addf %37, %41 : vector<8x8xf32>
    %43 = arith.index_cast %33 : i32 to index
    %c2_16 = arith.constant 2 : index
    %44 = memref.load %arg5[%43, %c2_16] : memref<4x4xf32, #tpu.memory_space<smem>>
    %45 = vector.broadcast %44 : f32 to vector<8x8xf32>
    %46 = arith.mulf %45, %6 : vector<8x8xf32>
    %47 = arith.addf %42, %46 : vector<8x8xf32>
    %48 = arith.index_cast %33 : i32 to index
    %c3_17 = arith.constant 3 : index
    %49 = memref.load %arg5[%48, %c3_17] : memref<4x4xf32, #tpu.memory_space<smem>>
    %50 = vector.broadcast %49 : f32 to vector<8x8xf32>
    %51 = arith.mulf %50, %8 : vector<8x8xf32>
    %52 = arith.addf %47, %51 : vector<8x8xf32>
    %cst_18 = arith.constant dense<0.000000e+00> : vector<16x8xf32>
    %53 = tpu.matmul %0, %52, %cst_18 {dimension_numbers = #tpu.dot_dimension_numbers<[1], [0], [0], [1], [0, 0, 1, 1], [], []>} : vector<16x8xf32>, vector<8x8xf32>, vector<16x8xf32> -> vector<16x8xf32>
    %c16_19 = arith.constant 16 : index
    %c0_20 = arith.constant 0 : index
    %54 = vector.load %arg8[%c16_19, %c0_20] : memref<64x8xf32, #tpu.memory_space<vmem>>, vector<16x8xf32>
    tpu.vector_store %arg8[%c16_19, %c0_20], %53 {strides = array<i32>} : memref<64x8xf32, #tpu.memory_space<vmem>>, vector<16x8xf32>,
    %c4_i32_21 = arith.constant 4 : i32
    %55 = arith.muli %arg1, %c4_i32_21 : i32
    %c2_i32 = arith.constant 2 : i32
    %56 = arith.addi %55, %c2_i32 : i32
    %57 = arith.index_cast %56 : i32 to index
    %c0_22 = arith.constant 0 : index
    %58 = memref.load %arg5[%57, %c0_22] : memref<4x4xf32, #tpu.memory_space<smem>>
    %59 = vector.broadcast %58 : f32 to vector<8x8xf32>
    %60 = arith.mulf %59, %2 : vector<8x8xf32>
    %61 = arith.index_cast %56 : i32 to index
    %c1_23 = arith.constant 1 : index
    %62 = memref.load %arg5[%61, %c1_23] : memref<4x4xf32, #tpu.memory_space<smem>>
    %63 = vector.broadcast %62 : f32 to vector<8x8xf32>
    %64 = arith.mulf %63, %4 : vector<8x8xf32>
    %65 = arith.addf %60, %64 : vector<8x8xf32>
    %66 = arith.index_cast %56 : i32 to index
    %c2_24 = arith.constant 2 : index
    %67 = memref.load %arg5[%66, %c2_24] : memref<4x4xf32, #tpu.memory_space<smem>>
    %68 = vector.broadcast %67 : f32 to vector<8x8xf32>
    %69 = arith.mulf %68, %6 : vector<8x8xf32>
    %70 = arith.addf %65, %69 : vector<8x8xf32>
    %71 = arith.index_cast %56 : i32 to index
    %c3_25 = arith.constant 3 : index
    %72 = memref.load %arg5[%71, %c3_25] : memref<4x4xf32, #tpu.memory_space<smem>>
    %73 = vector.broadcast %72 : f32 to vector<8x8xf32>
    %74 = arith.mulf %73, %8 : vector<8x8xf32>
    %75 = arith.addf %70, %74 : vector<8x8xf32>
    %cst_26 = arith.constant dense<0.000000e+00> : vector<16x8xf32>
    %76 = tpu.matmul %0, %75, %cst_26 {dimension_numbers = #tpu.dot_dimension_numbers<[1], [0], [0], [1], [0, 0, 1, 1], [], []>} : vector<16x8xf32>, vector<8x8xf32>, vector<16x8xf32> -> vector<16x8xf32>
    %c32 = arith.constant 32 : index
    %c0_27 = arith.constant 0 : index
    %77 = vector.load %arg8[%c32, %c0_27] : memref<64x8xf32, #tpu.memory_space<vmem>>, vector<16x8xf32>
    tpu.vector_store %arg8[%c32, %c0_27], %76 {strides = array<i32>} : memref<64x8xf32, #tpu.memory_space<vmem>>, vector<16x8xf32>,
    %c4_i32_28 = arith.constant 4 : i32
    %78 = arith.muli %arg1, %c4_i32_28 : i32
    %c3_i32 = arith.constant 3 : i32
    %79 = arith.addi %78, %c3_i32 : i32
    %80 = arith.index_cast %79 : i32 to index
    %c0_29 = arith.constant 0 : index
    %81 = memref.load %arg5[%80, %c0_29] : memref<4x4xf32, #tpu.memory_space<smem>>
    %82 = vector.broadcast %81 : f32 to vector<8x8xf32>
    %83 = arith.mulf %82, %2 : vector<8x8xf32>
    %84 = arith.index_cast %79 : i32 to index
    %c1_30 = arith.constant 1 : index
    %85 = memref.load %arg5[%84, %c1_30] : memref<4x4xf32, #tpu.memory_space<smem>>
    %86 = vector.broadcast %85 : f32 to vector<8x8xf32>
    %87 = arith.mulf %86, %4 : vector<8x8xf32>
    %88 = arith.addf %83, %87 : vector<8x8xf32>
    %89 = arith.index_cast %79 : i32 to index
    %c2_31 = arith.constant 2 : index
    %90 = memref.load %arg5[%89, %c2_31] : memref<4x4xf32, #tpu.memory_space<smem>>
    %91 = vector.broadcast %90 : f32 to vector<8x8xf32>
    %92 = arith.mulf %91, %6 : vector<8x8xf32>
    %93 = arith.addf %88, %92 : vector<8x8xf32>
    %94 = arith.index_cast %79 : i32 to index
    %c3_32 = arith.constant 3 : index
    %95 = memref.load %arg5[%94, %c3_32] : memref<4x4xf32, #tpu.memory_space<smem>>
    %96 = vector.broadcast %95 : f32 to vector<8x8xf32>
    %97 = arith.mulf %96, %8 : vector<8x8xf32>
    %98 = arith.addf %93, %97 : vector<8x8xf32>
    %cst_33 = arith.constant dense<0.000000e+00> : vector<16x8xf32>
    %99 = tpu.matmul %0, %98, %cst_33 {dimension_numbers = #tpu.dot_dimension_numbers<[1], [0], [0], [1], [0, 0, 1, 1], [], []>} : vector<16x8xf32>, vector<8x8xf32>, vector<16x8xf32> -> vector<16x8xf32>
    %c48 = arith.constant 48 : index
    %c0_34 = arith.constant 0 : index
    %100 = vector.load %arg8[%c48, %c0_34] : memref<64x8xf32, #tpu.memory_space<vmem>>, vector<16x8xf32>
    tpu.vector_store %arg8[%c48, %c0_34], %99 {strides = array<i32>} : memref<64x8xf32, #tpu.memory_space<vmem>>, vector<16x8xf32>,
    %c0_35 = arith.constant 0 : index
    %c0_36 = arith.constant 0 : index
    %101 = vector.load %arg8[%c0_35, %c0_36] : memref<64x8xf32, #tpu.memory_space<vmem>>, vector<64x8xf32>
    %c0_37 = arith.constant 0 : index
    %c0_38 = arith.constant 0 : index
    %102 = vector.load %arg4[%c0_37, %c0_38] : memref<8x16xf32, #tpu.memory_space<vmem>>, vector<8x16xf32>
    %cst_39 = arith.constant dense<0.000000e+00> : vector<64x16xf32>
    %103 = tpu.matmul %101, %102, %cst_39 {dimension_numbers = #tpu.dot_dimension_numbers<[1], [0], [0], [1], [0, 0, 1, 1], [], []>} : vector<64x8xf32>, vector<8x16xf32>, vector<64x16xf32> -> vector<64x16xf32>
    %c0_40 = arith.constant 0 : index
    %c0_41 = arith.constant 0 : index
    %104 = vector.load %arg6[%c0_40, %c0_41] : memref<64x1xf32, #tpu.memory_space<vmem>>, vector<64x1xf32>
    %105 = vector.broadcast %104 : vector<64x1xf32> to vector<64x16xf32>
    %106 = arith.addf %103, %105 : vector<64x16xf32>
    %c0_42 = arith.constant 0 : index
    %c0_43 = arith.constant 0 : index
    %c0_44 = arith.constant 0 : index
    %107 = vector.load %arg7[%c0_42, %c0_43, %c0_44] : memref<1x64x16xf32, #tpu.memory_space<vmem>>, vector<1x64x16xf32>
    %108 = vector.shape_cast %107 : vector<1x64x16xf32> to vector<64x16xf32>
    %109 = vector.shape_cast %106 : vector<64x16xf32> to vector<1x64x16xf32>
    tpu.vector_store %arg7[%c0_42, %c0_43, %c0_44], %109 {strides = array<i32>} : memref<1x64x16xf32, #tpu.memory_space<vmem>>, vector<1x64x16xf32>,
    return
  }
  func.func @transform_0(%arg0: i32, %arg1: i32) -> (i32, i32, i32) {
    %c0_i32 = arith.constant 0 : i32
    %c0_i32_0 = arith.constant 0 : i32
    %c0_i32_1 = arith.constant 0 : i32
    return %arg0, %c0_i32, %c0_i32_0 : i32, i32, i32
  }
  func.func @transform_1(%arg0: i32, %arg1: i32) -> (i32, i32) {
    %c0_i32 = arith.constant 0 : i32
    %c0_i32_0 = arith.constant 0 : i32
    %c0_i32_1 = arith.constant 0 : i32
    return %c0_i32, %c0_i32_0 : i32, i32
  }
  func.func @transform_2(%arg0: i32, %arg1: i32) -> (i32, i32) {
    %c0_i32 = arith.constant 0 : i32
    %c0_i32_0 = arith.constant 0 : i32
    %c0_i32_1 = arith.constant 0 : i32
    return %c0_i32, %c0_i32_0 : i32, i32
  }
  func.func @transform_3(%arg0: i32, %arg1: i32) -> (i32, i32) {
    %c0_i32 = arith.constant 0 : i32
    %c0_i32_0 = arith.constant 0 : i32
    %c0_i32_1 = arith.constant 0 : i32
    return %c0_i32, %c0_i32_0 : i32, i32
  }
  func.func @transform_4(%arg0: i32, %arg1: i32) -> (i32, i32) {
    %c0_i32 = arith.constant 0 : i32
    %c0_i32_0 = arith.constant 0 : i32
    return %arg1, %c0_i32 : i32, i32
  }
  func.func @transform_5(%arg0: i32, %arg1: i32) -> (i32, i32, i32) {
    %c0_i32 = arith.constant 0 : i32
    %c0_i32_0 = arith.constant 0 : i32
    return %arg0, %arg1, %c0_i32 : i32, i32, i32
  }
}

</mosaic_0001>

<bundles_post_ra>
// kernel: tpu_custom_call.1
= control target key start
LH: loop header
LB: loop body
LE: loop exit
PB: predicated region body
PF: predicated region fallthrough
CT: control target
= control target key end

     0   :  { %10 = vsyncpa [#allocation4], 0  ;;  %s1205_s18 = smov 0   ;;  %s1207_s19 = smov 0   ;;  %s1339_s0 = inlined_call_operand.vmem [shape: f32[2,32,8], index: 0, kind: input, shape index: {}]   ;;  %s1340_s1 = inlined_call_operand.vmem [shape: f32[16,8], index: 1, kind: input, shape index: {}]   ;;  %s1341_s2 = inlined_call_operand.vmem [shape: f32[8,16], index: 2, kind: input, shape index: {}]   ;;  %s1342_s3 = inlined_call_operand.vmem [shape: f32[4,4], index: 3, kind: input, shape index: {}]   ;;  %s1343_s4 = inlined_call_operand.vmem [shape: f32[64,1], index: 4, kind: input, shape index: {}]   ;;  %s1344_s5 = inlined_call_operand.vmem [shape: f32[2,64,16], index: 5, kind: output, shape index: {}]  }
   0x1   :  { %s1209_s20 = smov 0  }
   0x2 LB: > { %s988_s21 = sadd.s32 4294967295, %s1171_s20   ;;  %s28_s22 = sadd.s32 1, %s1167_s19  ;;  %s1171_s20 = sphi %s1209_s20, %s16_s20   ;;  %s1167_s19 = sphi %s1207_s19, %s1348_s19   ;;  %s1163_s18 = sphi %s1205_s18, %s1347_s18  }
   0x3   : > { %p30_p0 = scmp.ge.s32.totalorder %s28_s22, 2  ;;  %p990_p1 = scmp.ge.s32.totalorder %s1171_s20, 1 }
   0x4   : > { %p176_p2 = scmp.lt.s32.totalorder %s1171_s20, 3  ;;  %p1230_p4 = scmp.eq.s32.totalorder %s988_s21, 0 }
   0x5   : > { %s1350_s22 = smov (%p30_p0, %s28_s22), 0  ;;  %s195_s27 = sshll.u32 %s1342_s3, 4  ;;  %s196_s27 = int_to_ptr.vmem [resolvable:$true] %s195_s27 }
   0x6   : > { %p1226_p3 = pnand %p990_p1, %p176_p2  ;;  %s1130_s28 = scalar_lea.vmem %s196_s27, 64 }
   0x7   : > { %p1131_p7 = scmp.ne.s32.totalorder %s196_s27, %s1130_s28  ;;  %p1138_p11 = scmp.lt.s32.totalorder %s196_s27, %s196_s27 }
   0x8   : > { %p1096_p5 = pneg %p1226_p3  ;;  %p1139_p12 = scmp.lt.s32.totalorder %s1130_s28, %s1130_s28 }
   0xa   : > { %p1097_p6 = pnand %p1230_p4, %p1096_p5  ;;  %p1140_p13 = por %p1139_p12, %p1138_p11 }
   0xc   : > { %p1132_p8 = pneg %p1097_p6 }
   0xe   : > { %p1133_p9 = pnand %p1132_p8, %p1131_p7 }
  0x10   : > { %p1134_p10 = pneg %p1133_p9 }
  0x12   : > { %p1141_p0 = pnand %p1140_p13, %p1134_p10 }
  0x14   : > { %1144 = shalt.err (!%p1141_p0)
}
  0x15   : > { %s1173_s29 = smov [#allocation3]   ;;  %225 = sbr.rel (%p1226_p3) target bundleno = 461 (0x1cd), region = 40 }
  0x16   : > { %1099 = dma.vmem_to_smem (!%p1097_p6), %s196_s27, 64, %s1173_s29, [#allocation4]  }
  0x1a   : > { %1158 = dma.done.wait (%p1230_p4), [#allocation4], 64  }
  0x1b   : > { %1160 = vsyncadd (%p1230_p4), [#allocation4], 4294967232 }
  0x1c   : > { %231 = sfence }
  0x1d   : > { %p263_p1 = scmp.lt.s32.totalorder %s1163_s18, 1  ;;  %s292_s30 = sld [smem:[#allocation3]]  ;;  %v1251_v0 = vld [vmem:[%s1340_s1] sm:$0xff]  ;;  %vm310_vm0 = vcmask 64512   ;;  %v285_v21 = vld [vmem:[%s1340_s1 + $0x8] sm:$0xff]  ;;  %v696_v51 = vld [vmem:[%s1343_s4 + $0x10] sm:$0xff] }
  0x1e   : > { %s1000_s8 = sld [smem:[#allocation3 + $0x1]]  ;;  %1058 = vmatprep.mubr.msk.f32.mxu0 %vm310_vm0, %v1251_v0  ;;  %1063 = vmatprep.mubr.msk.f32.mxu1 %vm310_vm0, %v1251_v0  ;;  %v693_v50 = vld [vmem:[%s1341_s2] sm:$0xff]  ;;  %v1174_v53 = vmov 0   ;;  %v697_v54 = vld [vmem:[%s1343_s4 + $0x18] sm:$0xff]  ;;  %v695_v55 = vld [vmem:[%s1343_s4 + $0x8] sm:$0xff]  ;;  %vm871_vm1 = vcmask 130048  }
  0x1f   : > { %s1352_s18 = smov (!%p263_p1, %s1163_s18), 1  ;;  %s1001_s9 = sld [smem:[#allocation3 + $0x2]]  ;;  %v694_v52 = vld [vmem:[%s1343_s4] sm:$0xff]  ;;  %1129 = vset.pattern.permute.xlu1 %v1174_v53  ;;  %1128 = vset.pattern.permute.xlu0 %v1174_v53  ;;  %v699_v56 = vld [vmem:[%s1343_s4 + $0x28] sm:$0xff]  ;;  %v701_v58 = vld [vmem:[%s1343_s4 + $0x38] sm:$0xff] }
  0x20   : > { %s1033_s10 = sshll.u32 %s1352_s18, 5  ;;  %s1002_s14 = sld [smem:[#allocation3 + $0x3]]  ;;  %714 = vperm.xlu1 %1129, %v696_v51   ;;  %704 = vperm.xlu0 %1128, %v694_v52   ;;  %v698_v57 = vld [vmem:[%s1343_s4 + $0x20] sm:$0xff]  ;;  %v700_v59 = vld [vmem:[%s1343_s4 + $0x30] sm:$0xff] }
  0x21   : > { %s267_s13 = scalar_lea.vmem %s1339_s0, %s1033_s10  ;;  %s1011_s15 = sld [smem:[#allocation3 + $0x100]] }
  0x22   : > { %v286_v1 = vld [vmem:[%s267_s13] sm:$0xff]  ;;  %v287_v2 = vld [vmem:[%s267_s13 + $0x8] sm:$0xff]  ;;  %v288_v4 = vld [vmem:[%s267_s13 + $0x10] sm:$0xff]  ;;  %s1012_s16 = sld [smem:[#allocation3 + $0x101]] }
  0x23   : > { %v293_v3 = vstv %s292_s30  ;;  %s1013_s17 = sld [smem:[#allocation3 + $0x102]]  ;;  %v289_v9 = vld [vmem:[%s267_s13 + $0x18] sm:$0xff] }
  0x24   : > { %v294_v5 = vmul.f32 %v293_v3, %v286_v1  ;;  %v297_v6 = vstv %s1000_s8  ;;  %s1014_s21 = sld [smem:[#allocation3 + $0x103]]  ;;  %719 = vperm.xlu1 %1129, %v697_v54   ;;  %709 = vperm.xlu0 %1128, %v695_v55  }
  0x25   : > { %v298_v7 = vmul.f32 %v297_v6, %v287_v2  ;;  %v302_v8 = vstv %s1001_s9  ;;  %s1005_s23 = sld [smem:[#allocation3 + $0x80]] }
  0x26   : > { %v303_v11 = vmul.f32 %v302_v8, %v288_v4  ;;  %v307_v13 = vstv %s1002_s14  ;;  %s1006_s24 = sld [smem:[#allocation3 + $0x81]] }
  0x27   : > { %v299_v10 = vadd.f32 %v298_v7, %v294_v5  ;;  %v308_v14 = vmul.f32 %v307_v13, %v289_v9  ;;  %v494_v15 = vstv %s1011_s15  ;;  %s1007_s25 = sld [smem:[#allocation3 + $0x82]] }
  0x28   : > { %v495_v16 = vmul.f32 %v494_v15, %v286_v1  ;;  %v498_v17 = vstv %s1012_s16  ;;  %s1008_s26 = sld [smem:[#allocation3 + $0x83]]  ;;  %729 = vperm.xlu1 %1129, %v699_v56   ;;  %724 = vperm.xlu0 %1128, %v698_v57  }
  0x29   : > { %v304_v12 = vadd.f32 %v303_v11, %v299_v10  ;;  %v499_v19 = vmul.f32 %v498_v17, %v287_v2  ;;  %v503_v20 = vstv %s1013_s17  ;;  %s1017_s27 = sld [smem:[#allocation3 + $0x180]] }
  0x2a   : > { %v504_v22 = vmul.f32 %v503_v20, %v288_v4  ;;  %v508_v23 = vstv %s1014_s21  ;;  %s1018_s30 = sld [smem:[#allocation3 + $0x181]] }
  0x2b   : > { %v309_v18 = vadd.f32 %v308_v14, %v304_v12  ;;  %v500_v24 = vadd.f32 %v499_v19, %v495_v16  ;;  %v509_v25 = vmul.f32 %v508_v23, %v289_v9  ;;  %v397_v26 = vstv %s1005_s23  ;;  %s1019_s6 = sld [smem:[#allocation3 + $0x182]] }
  0x2c   : > { %v398_v27 = vmul.f32 %v397_v26, %v286_v1  ;;  %v401_v28 = vstv %s1006_s24  ;;  %s1020_s7 = sld [smem:[#allocation3 + $0x183]]  ;;  %739 = vperm.xlu1 %1129, %v701_v58   ;;  %734 = vperm.xlu0 %1128, %v700_v59  }
  0x2d   : > { %1056 = vmatprep.subr.mxu0 %v309_v18  ;;  %v505_v29 = vadd.f32 %v504_v22, %v500_v24  ;;  %v402_v30 = vmul.f32 %v401_v28, %v287_v2  ;;  %v406_v31 = vstv %s1007_s25 }
  0x2e   : > { %1057 = vmatpush3.msra.mxu0 %v309_v18  ;;  %v407_v32 = vmul.f32 %v406_v31, %v288_v4  ;;  %v411_v33 = vstv %s1008_s26 }
  0x2f   : > { %1059 = vmatmul.mubr.msk.f32.vlgmr.msra.gmra.mxu0 %vm310_vm0, %v285_v21  ;;  %v510_v34 = vadd.f32 %v509_v25, %v505_v29  ;;  %v403_v35 = vadd.f32 %v402_v30, %v398_v27  ;;  %v412_v36 = vmul.f32 %v411_v33, %v289_v9  ;;  %v591_v37 = vstv %s1017_s27 }
  0x30   : > { %1068 = vmatprep.mubr.msk.f32.mxu0 %vm310_vm0, %v1251_v0  ;;  %v592_v38 = vmul.f32 %v591_v37, %v286_v1  ;;  %v595_v39 = vstv %s1018_s30  ;;  %s1034_s30 = sshll.u32 %s1352_s18, 6 }
  0x31   : > { %1066 = vmatprep.subr.mxu0 %v510_v34  ;;  %v408_v40 = vadd.f32 %v407_v32, %v403_v35  ;;  %v596_v41 = vmul.f32 %v595_v39, %v287_v2  ;;  %v600_v42 = vstv %s1019_s6  ;;  %s282_s8 = scalar_lea.vmem %s1344_s5, %s1034_s30 }
  0x32   : > { %1067 = vmatpush3.msra.mxu0 %v510_v34  ;;  %v601_v43 = vmul.f32 %v600_v42, %v288_v4  ;;  %v605_v44 = vstv %s1020_s7 }
  0x33   : > { %v413_v45 = vadd.f32 %v412_v36, %v408_v40  ;;  %1069 = vmatmul.mubr.msk.f32.vlgmr.msra.gmra.mxu0 %vm310_vm0, %v285_v21  ;;  %v597_v46 = vadd.f32 %v596_v41, %v592_v38  ;;  %v606_v47 = vmul.f32 %v605_v44, %v289_v9  ;;  %1076 = vmatprep.subr.mxu0 %v693_v50 }
  0x34   : > { %1077 = vmatpush3.msra.mxu0 %v693_v50 }
  0x35   : > { %1061 = vmatprep.subr.mxu1 %v413_v45  ;;  %v602_v48 = vadd.f32 %v601_v43, %v597_v46 }
  0x36   : > { %1062 = vmatpush3.msra.mxu1 %v413_v45 }
  0x37   : > { %1064 = vmatmul.mubr.msk.f32.vlgmr.msra.gmra.mxu1 %vm310_vm0, %v285_v21  ;;  %v607_v49 = vadd.f32 %v606_v47, %v602_v48 }
  0x38   : > { %1073 = vmatprep.mubr.msk.f32.mxu1 %vm310_vm0, %v1251_v0 }
  0x39   : > { %1071 = vmatprep.subr.mxu1 %v607_v49 }
  0x3a   : > { %1072 = vmatpush3.msra.mxu1 %v607_v49 }
  0x3b   : > { %1074 = vmatmul.mubr.msk.f32.vlgmr.msra.gmra.mxu1 %vm310_vm0, %v285_v21  ;;  %1090 = vmatprep.subr.mxu1 %v693_v50 }
  0x3c   : > { %1091 = vmatpush3.msra.mxu1 %v693_v50 }
  0x9b   : > { %v715_v12 = vpop.permute.xlu1 %714  ;;  %v705_v13 = vpop.permute.xlu0 %704 }
  0x9f   : > { %v720_v14 = vpop.permute.xlu1 %719  ;;  %v710_v15 = vpop.permute.xlu0 %709 }
  0xa3   : > { %v730_v20 = vpop.permute.xlu1 %729  ;;  %v725_v23 = vpop.permute.xlu0 %724 }
  0xa7   : > { %v740_v30 = vpop.permute.xlu1 %739  ;;  %v735_v33 = vpop.permute.xlu0 %734 }
  0xef   : > { %v1060_v60 = vpop.f32.mrf.mxu0 }
  0xf0   : > { %393 = vst.msk [vmem:[#allocation2 + $0x8] sm:$0xff] %vm310_vm0, %v1060_v60 }
  0xf1   : > { %v383_v61 = vpop.f32.mrf.mxu0 }
  0xf2   : > { %392 = vst.msk [vmem:[#allocation2] sm:$0xff] %vm310_vm0, %v383_v61 }
  0xf3   : > { %v1070_v62 = vpop.f32.mrf.mxu0 }
  0xf4   : > { %587 = vst.msk [vmem:[#allocation2 + $0x28] sm:$0xff] %vm310_vm0, %v1070_v62 }
  0xf5   : > { %v577_v63 = vpop.f32.mrf.mxu0 }
  0xf6   : > { %586 = vst.msk [vmem:[#allocation2 + $0x20] sm:$0xff] %vm310_vm0, %v577_v63 }
  0xf7   : > { %v1065_v0 = vpop.f32.mrf.mxu1  ;;  %v686_v2 = vld [vmem:[#allocation2 + $0x8] sm:$0xff] }
  0xf8   : > { %490 = vst.msk [vmem:[#allocation2 + $0x18] sm:$0xff] %vm310_vm0, %v1065_v0 }
  0xf9   : > { %v685_v1 = vld [vmem:[#allocation2] sm:$0xff]  ;;  %v480_v3 = vpop.f32.mrf.mxu1 }
  0xfa   : > { %1078 = vmatprep.mubr.msk.f32.mxu0 %vm310_vm0, %v685_v1  ;;  %489 = vst.msk [vmem:[#allocation2 + $0x10] sm:$0xff] %vm310_vm0, %v480_v3 }
  0xfb   : > { %1079 = vmatmul.mubr.msk.f32.vlgmr.msra.gmra.mxu0 %vm310_vm0, %v686_v2  ;;  %v1075_v4 = vpop.f32.mrf.mxu1  ;;  %v690_v7 = vld [vmem:[#allocation2 + $0x28] sm:$0xff] }
  0xfc   : > { %684 = vst.msk [vmem:[#allocation2 + $0x38] sm:$0xff] %vm310_vm0, %v1075_v4 }
  0xfd   : > { %v674_v5 = vpop.f32.mrf.mxu1  ;;  %v689_v6 = vld [vmem:[#allocation2 + $0x20] sm:$0xff] }
  0xfe   : > { %683 = vst.msk [vmem:[#allocation2 + $0x30] sm:$0xff] %vm310_vm0, %v674_v5  ;;  %1084 = vmatprep.mubr.msk.f32.mxu1 %vm310_vm0, %v689_v6 }
  0xff   : > { %1085 = vmatmul.mubr.msk.f32.vlgmr.msra.gmra.mxu1 %vm310_vm0, %v690_v7  ;;  %v688_v9 = vld [vmem:[#allocation2 + $0x18] sm:$0xff] }
 0x101   : > { %v687_v8 = vld [vmem:[#allocation2 + $0x10] sm:$0xff] }
 0x102   : > { %1081 = vmatprep.mubr.msk.f32.mxu0 %vm310_vm0, %v687_v8 }
 0x103   : > { %1082 = vmatmul.mubr.msk.f32.gmra.mxu0 %vm310_vm0, %v688_v9  ;;  %v692_v11 = vld [vmem:[#allocation2 + $0x38] sm:$0xff] }
 0x105   : > { %v691_v10 = vld [vmem:[#allocation2 + $0x30] sm:$0xff] }
 0x106   : > { %1087 = vmatprep.mubr.msk.f32.mxu1 %vm310_vm0, %v691_v10 }
 0x107   : > { %1088 = vmatmul.mubr.msk.f32.gmra.mxu1 %vm310_vm0, %v692_v11 }
 0x1bb   : > { %v1080_v16 = vpop.f32.mrf.mxu0 }
 0x1bc   : > { %v838_v17 = vadd.f32 %v1080_v16, %v710_v15 }
 0x1bd   : > { %v832_v18 = vpop.f32.mrf.mxu0 }
 0x1be   : > { %873 = vst.msk [vmem:[%s282_s8 + $0x8] sm:$0xff] %vm871_vm1, %v838_v17  ;;  %v833_v19 = vadd.f32 %v832_v18, %v705_v13 }
 0x1bf   : > { %v1086_v21 = vpop.f32.mrf.mxu1 }
 0x1c0   : > { %872 = vst.msk [vmem:[%s282_s8] sm:$0xff] %vm871_vm1, %v833_v19  ;;  %v858_v22 = vadd.f32 %v1086_v21, %v730_v20 }
 0x1c1   : > { %v852_v24 = vpop.f32.mrf.mxu1 }
 0x1c2   : > { %877 = vst.msk [vmem:[%s282_s8 + $0x28] sm:$0xff] %vm871_vm1, %v858_v22  ;;  %v853_v25 = vadd.f32 %v852_v24, %v725_v23 }
 0x1c3   : > { %v1083_v26 = vpop.f32.mrf.mxu0 }
 0x1c4   : > { %v848_v27 = vadd.f32 %v1083_v26, %v720_v14  ;;  %876 = vst.msk [vmem:[%s282_s8 + $0x20] sm:$0xff] %vm871_vm1, %v853_v25 }
 0x1c5   : > { %v842_v28 = vpop.f32.mrf.mxu0 }
 0x1c6   : > { %875 = vst.msk [vmem:[%s282_s8 + $0x18] sm:$0xff] %vm871_vm1, %v848_v27  ;;  %v843_v29 = vadd.f32 %v842_v28, %v715_v12 }
 0x1c7   : > { %v1089_v31 = vpop.f32.mrf.mxu1 }
 0x1c8   : > { %874 = vst.msk [vmem:[%s282_s8 + $0x10] sm:$0xff] %vm871_vm1, %v843_v29  ;;  %v868_v32 = vadd.f32 %v1089_v31, %v740_v30 }
 0x1c9   : > { %v862_v34 = vpop.f32.mrf.mxu1 }
 0x1ca   : > { %879 = vst.msk [vmem:[%s282_s8 + $0x38] sm:$0xff] %vm871_vm1, %v868_v32  ;;  %v863_v35 = vadd.f32 %v862_v34, %v735_v33 }
 0x1cc   : > { %878 = vst.msk [vmem:[%s282_s8 + $0x30] sm:$0xff] %vm871_vm1, %v863_v35 }
 0x1cd PF: > { %s16_s20 = sadd.s32 1, %s1171_s20   ;;  %s1347_s18 = smov %s1167_s19 }
 0x1ce   : > { %p13_p2 = scmp.ge.s32.totalorder %s16_s20, 4   ;;  %s1348_s19 = smov %s1350_s22 }
 0x1d0   :  { %15 = sbr.rel (!%p13_p2) target bundleno = 2 (0x2), region = 78 }
 0x1d5   :  { %910 = vsyncpa [#allocation4], 1 }
 0x1d6   :  { %912 = vsyncpa [#allocation4 + $0x1], 1 }

</bundles_post_ra>
